<compile_context>
chip_gen: v7x
topology: tpu7x:2x2x1
jax: 0.10.0
libtpu: 0.0.40
codegen_flags: <defaults>
</compile_context>

<pallas_src>
import functools

import jax
import jax.numpy as jnp
from jax.experimental import pallas as pl
from jax.experimental.pallas import tpu as pltpu


def _round_up(x, m):
    return (x + m - 1) // m * m


def _safety_critic_kernel(obs_ref, act_ref, w1o_ref, w1a_ref, w2_ref, w3_ref,
                          b_ref, out_ref, *, compute_dtype):
    cd = compute_dtype
    obs = obs_ref[...].astype(cd)
    act = act_ref[...].astype(cd)

    # Layer 1 (fused QC|VC): split-dot replaces torch.cat([obs, action], -1).
    h = (jnp.dot(obs, w1o_ref[...], preferred_element_type=jnp.float32)
         + jnp.dot(act, w1a_ref[...], preferred_element_type=jnp.float32)
         + b_ref[0:1, :])
    h = jnp.maximum(h, 0.0)                                   # ReLU (f32)

    # Layer 2: block-diagonal fused weight -> one MXU push for both heads.
    h = (jnp.dot(h.astype(cd), w2_ref[...], preferred_element_type=jnp.float32)
         + b_ref[1:2, :])
    h = jnp.maximum(h, 0.0)                                   # ReLU (f32)

    # Layer 3: (2H, 2) -> column 0 = QC, column 1 = VC.
    b3 = b_ref[2:3, :][:, 0:2]
    out = (jnp.dot(h.astype(cd), w3_ref[...], preferred_element_type=jnp.float32)
           + b3)
    out_ref[...] = out.astype(out_ref.dtype)


def safety_critic_forward(obs, action, packed, *, tile_b=None,
                          compute_dtype=jnp.float32):
    """Fused SafetyCritic forward. Returns (qc, vc), each (B, 1) float32."""
    assert obs.shape[0] == action.shape[0]
    B = obs.shape[0]
    obs_dim = obs.shape[1]
    act_dim = action.shape[1]

    w1o = packed["w1_obs"].astype(compute_dtype)
    w1a = packed["w1_act"].astype(compute_dtype)
    w2 = packed["w2"].astype(compute_dtype)
    w3 = packed["w3"].astype(compute_dtype)
    bias = packed["bias"]                      # bias / ReLU stay f32

    # Batch tile: multiple of 8 (f32 sublanes); large tiles amortize the
    # ~0.35us/step overhead and approach the HBM roofline at large B.
    if tile_b is None:
        tile_b = min(1024, _round_up(B, 8))
    tile_b = _round_up(tile_b, 8)
    padded_b = _round_up(max(B, tile_b), tile_b)
    if padded_b != B:
        pad = padded_b - B
        obs = jnp.pad(obs, ((0, pad), (0, 0)))
        action = jnp.pad(action, ((0, pad), (0, 0)))

    grid = (padded_b // tile_b,)

    def resident(shape):
        # Weights/biases: same block every grid step -> stay in VMEM.
        return pl.BlockSpec(shape, lambda i: (0, 0))

    out = pl.pallas_call(
        functools.partial(_safety_critic_kernel, compute_dtype=compute_dtype),
        out_shape=jax.ShapeDtypeStruct((padded_b, 2), jnp.float32),
        grid=grid,
        in_specs=[
            pl.BlockSpec((tile_b, obs_dim), lambda i: (i, 0)),
            pl.BlockSpec((tile_b, act_dim), lambda i: (i, 0)),
            resident(w1o.shape),
            resident(w1a.shape),
            resident(w2.shape),
            resident(w3.shape),
            resident(bias.shape),
        ],
        out_specs=pl.BlockSpec((tile_b, 2), lambda i: (i, 0)),
        compiler_params=pltpu.CompilerParams(
            dimension_semantics=("parallel",),   # megacore sharding on v7x
        ),
    )(obs, action, w1o, w1a, w2, w3, bias)

    qc = out[:B, 0:1]
    vc = out[:B, 1:2]
    return qc, vc


def init_params(key, obs_dim, action_dim, hidden_dim):
    """Synthetic init matching utils.mlp(in, hidden, 1, hidden_depth=2).

    Weights stored as (in_features, out_features); biases as (1, out)."""
    in_dim = obs_dim + action_dim
    layer_dims = [(in_dim, hidden_dim), (hidden_dim, hidden_dim), (hidden_dim, 1)]
    params = {}
    for net in ("qc", "vc"):
        for li, (fan_in, fan_out) in enumerate(layer_dims, start=1):
            key, kw, kb = jax.random.split(key, 3)
            scale = 1.0 / jnp.sqrt(jnp.float32(fan_in))
            params[f"{net}_w{li}"] = (
                jax.random.uniform(kw, (fan_in, fan_out), jnp.float32, -1.0, 1.0)
                * scale)
            params[f"{net}_b{li}"] = (
                jax.random.uniform(kb, (1, fan_out), jnp.float32, -1.0, 1.0)
                * scale)
    return params


def pack_params(params, obs_dim):
    """Fuse the QC and VC MLPs into one lane-packed weight set."""
    h = params["qc_w1"].shape[1]

    w1 = jnp.concatenate([params["qc_w1"], params["vc_w1"]], axis=1)  # (in, 2H)

    w2 = jnp.zeros((2 * h, 2 * h), jnp.float32)
    w2 = w2.at[:h, :h].set(params["qc_w2"]).at[h:, h:].set(params["vc_w2"])

    w3 = jnp.zeros((2 * h, 2), jnp.float32)
    w3 = w3.at[:h, 0:1].set(params["qc_w3"]).at[h:, 1:2].set(params["vc_w3"])

    bias = jnp.zeros((3, 2 * h), jnp.float32)
    bias = bias.at[0, :h].set(params["qc_b1"][0]).at[0, h:].set(params["vc_b1"][0])
    bias = bias.at[1, :h].set(params["qc_b2"][0]).at[1, h:].set(params["vc_b2"][0])
    bias = bias.at[2, 0].set(params["qc_b3"][0, 0]).at[2, 1].set(params["vc_b3"][0, 0])

    return {
        "w1_obs": w1[:obs_dim],
        "w1_act": w1[obs_dim:],
        "w2": w2,
        "w3": w3,
        "bias": bias,
    }


def _reference_forward(obs, action, params):
    """Plain-JAX reference (unfused) for correctness checking."""
    x = jnp.concatenate([obs, action], axis=-1)

    def mlp(pfx):
        h = jnp.maximum(x @ params[f"{pfx}_w1"] + params[f"{pfx}_b1"], 0.0)
        h = jnp.maximum(h @ params[f"{pfx}_w2"] + params[f"{pfx}_b2"], 0.0)
        return h @ params[f"{pfx}_w3"] + params[f"{pfx}_b3"]

    return mlp("qc"), mlp("vc")


if __name__ == "__main__":
    obs_dim, action_dim, hidden_dim = 12, 4, 32

    key = jax.random.PRNGKey(0)
    k_obs, k_act, k_params = jax.random.split(key, 3)
    params = init_params(k_params, obs_dim, action_dim, hidden_dim)
    packed = pack_params(params, obs_dim)

    # Small batch (single grid step).
    batch = 8
    obs = jax.random.normal(k_obs, (batch, obs_dim), jnp.float32)
    action = jax.random.normal(k_act, (batch, action_dim), jnp.float32)
    qc, vc = safety_critic_forward(obs, action, packed)
    jax.block_until_ready((qc, vc))
    qc_ref, vc_ref = _reference_forward(obs, action, params)
    assert qc.shape == (batch, 1) and vc.shape == (batch, 1)
    assert jnp.allclose(qc, qc_ref, atol=1e-5, rtol=1e-5)
    assert jnp.allclose(vc, vc_ref, atol=1e-5, rtol=1e-5)

    # Ragged batch: exercises the batch grid + padding path (200 -> 256, 4 steps).
    batch2 = 200
    k_obs2, k_act2 = jax.random.split(k_obs)
    obs2 = jax.random.normal(k_obs2, (batch2, obs_dim), jnp.float32)
    action2 = jax.random.normal(k_act2, (batch2, action_dim), jnp.float32)
    qc2, vc2 = safety_critic_forward(obs2, action2, packed, tile_b=64)
    jax.block_until_ready((qc2, vc2))
    qc2_ref, vc2_ref = _reference_forward(obs2, action2, params)
    assert qc2.shape == (batch2, 1) and vc2.shape == (batch2, 1)
    assert jnp.allclose(qc2, qc2_ref, atol=1e-5, rtol=1e-5)
    assert jnp.allclose(vc2, vc2_ref, atol=1e-5, rtol=1e-5)

    # bf16 MXU-input path (perf option for v6e/v7x), f32 accumulation.
    qc3, vc3 = safety_critic_forward(obs2, action2, packed, tile_b=64,
                                     compute_dtype=jnp.bfloat16)
    jax.block_until_ready((qc3, vc3))
    assert jnp.allclose(qc3, qc2_ref, atol=0.1, rtol=0.1)
    assert jnp.allclose(vc3, vc2_ref, atol=0.1, rtol=0.1)

    # TODO(synk): self.outputs dict / log() logger hooks are host-side
    # bookkeeping with no kernel equivalent; forward returns (qc, vc) only.
    print("KERNEL_OK")
</pallas_src>

<mosaic_0001>
module attributes {stable_mosaic.version = 11 : i64} {
  func.func @_safety_critic_kernel(%arg0: i32, %arg1: memref<8x12xf32, #tpu.memory_space<vmem>>, %arg2: memref<8x4xf32, #tpu.memory_space<vmem>>, %arg3: memref<12x64xf32, #tpu.memory_space<vmem>>, %arg4: memref<4x64xf32, #tpu.memory_space<vmem>>, %arg5: memref<64x64xf32, #tpu.memory_space<vmem>>, %arg6: memref<64x2xf32, #tpu.memory_space<vmem>>, %arg7: memref<3x64xf32, #tpu.memory_space<vmem>>, %arg8: memref<8x2xf32, #tpu.memory_space<vmem>>) attributes {dimension_semantics = [#tpu.dimension_semantics<parallel>], iteration_bounds = array<i64: 1>, scalar_prefetch = 0 : i64, scratch_operands = 0 : i64, tpu.core_type = #tpu.core_type<tc>, window_params = [{transform_indices = @transform_0, window_bounds = array<i64: 8, 12>}, {transform_indices = @transform_1, window_bounds = array<i64: 8, 4>}, {pipeline_mode = #tpu.pipeline_mode<synchronous>, transform_indices = @transform_2, window_bounds = array<i64: 12, 64>}, {pipeline_mode = #tpu.pipeline_mode<synchronous>, transform_indices = @transform_3, window_bounds = array<i64: 4, 64>}, {pipeline_mode = #tpu.pipeline_mode<synchronous>, transform_indices = @transform_4, window_bounds = array<i64: 64, 64>}, {pipeline_mode = #tpu.pipeline_mode<synchronous>, transform_indices = @transform_5, window_bounds = array<i64: 64, 2>}, {pipeline_mode = #tpu.pipeline_mode<synchronous>, transform_indices = @transform_6, window_bounds = array<i64: 3, 64>}, {transform_indices = @transform_7, window_bounds = array<i64: 8, 2>}]} {
    %c0 = arith.constant 0 : index
    %c0_0 = arith.constant 0 : index
    %0 = vector.load %arg1[%c0, %c0_0] : memref<8x12xf32, #tpu.memory_space<vmem>>, vector<8x12xf32>
    %c0_1 = arith.constant 0 : index
    %c0_2 = arith.constant 0 : index
    %1 = vector.load %arg2[%c0_1, %c0_2] : memref<8x4xf32, #tpu.memory_space<vmem>>, vector<8x4xf32>
    %c0_3 = arith.constant 0 : index
    %c0_4 = arith.constant 0 : index
    %2 = vector.load %arg3[%c0_3, %c0_4] : memref<12x64xf32, #tpu.memory_space<vmem>>, vector<12x64xf32>
    %cst = arith.constant dense<0.000000e+00> : vector<8x64xf32>
    %3 = tpu.matmul %0, %2, %cst {dimension_numbers = #tpu.dot_dimension_numbers<[1], [0], [0], [1], [0, 0, 1, 1], [], []>} : vector<8x12xf32>, vector<12x64xf32>, vector<8x64xf32> -> vector<8x64xf32>
    %c0_5 = arith.constant 0 : index
    %c0_6 = arith.constant 0 : index
    %4 = vector.load %arg4[%c0_5, %c0_6] : memref<4x64xf32, #tpu.memory_space<vmem>>, vector<4x64xf32>
    %cst_7 = arith.constant dense<0.000000e+00> : vector<8x64xf32>
    %5 = tpu.matmul %1, %4, %cst_7 {dimension_numbers = #tpu.dot_dimension_numbers<[1], [0], [0], [1], [0, 0, 1, 1], [], []>} : vector<8x4xf32>, vector<4x64xf32>, vector<8x64xf32> -> vector<8x64xf32>
    %6 = arith.addf %3, %5 : vector<8x64xf32>
    %c0_8 = arith.constant 0 : index
    %c0_9 = arith.constant 0 : index
    %7 = vector.load %arg7[%c0_8, %c0_9] : memref<3x64xf32, #tpu.memory_space<vmem>>, vector<1x64xf32>
    %8 = vector.broadcast %7 : vector<1x64xf32> to vector<8x64xf32>
    %9 = arith.addf %6, %8 : vector<8x64xf32>
    %cst_10 = arith.constant 0.000000e+00 : f32
    %10 = vector.broadcast %cst_10 : f32 to vector<8x64xf32>
    %11 = arith.maximumf %9, %10 : vector<8x64xf32>
    %c0_11 = arith.constant 0 : index
    %c0_12 = arith.constant 0 : index
    %12 = vector.load %arg5[%c0_11, %c0_12] : memref<64x64xf32, #tpu.memory_space<vmem>>, vector<64x64xf32>
    %cst_13 = arith.constant dense<0.000000e+00> : vector<8x64xf32>
    %13 = tpu.matmul %11, %12, %cst_13 {dimension_numbers = #tpu.dot_dimension_numbers<[1], [0], [0], [1], [0, 0, 1, 1], [], []>} : vector<8x64xf32>, vector<64x64xf32>, vector<8x64xf32> -> vector<8x64xf32>
    %c1 = arith.constant 1 : index
    %c0_14 = arith.constant 0 : index
    %14 = vector.load %arg7[%c1, %c0_14] : memref<3x64xf32, #tpu.memory_space<vmem>>, vector<1x64xf32>
    %15 = vector.broadcast %14 : vector<1x64xf32> to vector<8x64xf32>
    %16 = arith.addf %13, %15 : vector<8x64xf32>
    %cst_15 = arith.constant 0.000000e+00 : f32
    %17 = vector.broadcast %cst_15 : f32 to vector<8x64xf32>
    %18 = arith.maximumf %16, %17 : vector<8x64xf32>
    %c2 = arith.constant 2 : index
    %c0_16 = arith.constant 0 : index
    %19 = vector.load %arg7[%c2, %c0_16] : memref<3x64xf32, #tpu.memory_space<vmem>>, vector<1x64xf32>
    %20 = vector.extract_strided_slice %19 {offsets = [0, 0], sizes = [1, 2], strides = [1, 1]} : vector<1x64xf32> to vector<1x2xf32>
    %c0_17 = arith.constant 0 : index
    %c0_18 = arith.constant 0 : index
    %21 = vector.load %arg6[%c0_17, %c0_18] : memref<64x2xf32, #tpu.memory_space<vmem>>, vector<64x2xf32>
    %cst_19 = arith.constant dense<0.000000e+00> : vector<8x2xf32>
    %22 = tpu.matmul %18, %21, %cst_19 {dimension_numbers = #tpu.dot_dimension_numbers<[1], [0], [0], [1], [0, 0, 1, 1], [], []>} : vector<8x64xf32>, vector<64x2xf32>, vector<8x2xf32> -> vector<8x2xf32>
    %23 = vector.broadcast %20 : vector<1x2xf32> to vector<8x2xf32>
    %24 = arith.addf %22, %23 : vector<8x2xf32>
    %c0_20 = arith.constant 0 : index
    %c0_21 = arith.constant 0 : index
    %25 = vector.load %arg8[%c0_20, %c0_21] : memref<8x2xf32, #tpu.memory_space<vmem>>, vector<8x2xf32>
    tpu.vector_store %arg8[%c0_20, %c0_21], %24 {strides = array<i32>} : memref<8x2xf32, #tpu.memory_space<vmem>>, vector<8x2xf32>,
    return
  }
  func.func @transform_0(%arg0: i32) -> (i32, i32) {
    %c0_i32 = arith.constant 0 : i32
    %c0_i32_0 = arith.constant 0 : i32
    return %arg0, %c0_i32 : i32, i32
  }
  func.func @transform_1(%arg0: i32) -> (i32, i32) {
    %c0_i32 = arith.constant 0 : i32
    %c0_i32_0 = arith.constant 0 : i32
    return %arg0, %c0_i32 : i32, i32
  }
  func.func @transform_2(%arg0: i32) -> (i32, i32) {
    %c0_i32 = arith.constant 0 : i32
    %c0_i32_0 = arith.constant 0 : i32
    %c0_i32_1 = arith.constant 0 : i32
    return %c0_i32, %c0_i32_0 : i32, i32
  }
  func.func @transform_3(%arg0: i32) -> (i32, i32) {
    %c0_i32 = arith.constant 0 : i32
    %c0_i32_0 = arith.constant 0 : i32
    %c0_i32_1 = arith.constant 0 : i32
    return %c0_i32, %c0_i32_0 : i32, i32
  }
  func.func @transform_4(%arg0: i32) -> (i32, i32) {
    %c0_i32 = arith.constant 0 : i32
    %c0_i32_0 = arith.constant 0 : i32
    %c0_i32_1 = arith.constant 0 : i32
    return %c0_i32, %c0_i32_0 : i32, i32
  }
  func.func @transform_5(%arg0: i32) -> (i32, i32) {
    %c0_i32 = arith.constant 0 : i32
    %c0_i32_0 = arith.constant 0 : i32
    %c0_i32_1 = arith.constant 0 : i32
    return %c0_i32, %c0_i32_0 : i32, i32
  }
  func.func @transform_6(%arg0: i32) -> (i32, i32) {
    %c0_i32 = arith.constant 0 : i32
    %c0_i32_0 = arith.constant 0 : i32
    %c0_i32_1 = arith.constant 0 : i32
    return %c0_i32, %c0_i32_0 : i32, i32
  }
  func.func @transform_7(%arg0: i32) -> (i32, i32) {
    %c0_i32 = arith.constant 0 : i32
    %c0_i32_0 = arith.constant 0 : i32
    return %arg0, %c0_i32 : i32, i32
  }
}

</mosaic_0001>

<bundles_post_ra>
// kernel: tpu_custom_call.1
= control target key start
LH: loop header
LB: loop body
LE: loop exit
PB: predicated region body
PF: predicated region fallthrough
CT: control target
= control target key end

     0   :  { %vm35_vm0 = vcmask 1043456   ;;  %v487_v0 = vmov 0.0|0.0   ;;  %v488_v1 = vmov 0.0   ;;  %vm489_vm1 = vmmov 1   ;;  %s612_s2 = inlined_call_operand.vmem [shape: f32[12,64], index: 2, kind: input, shape index: {}]   ;;  %s613_s3 = inlined_call_operand.vmem [shape: f32[4,64], index: 3, kind: input, shape index: {}]   ;;  %s614_s1 = inlined_call_operand.vmem [shape: f32[8,4], index: 1, kind: input, shape index: {}]   ;;  %s615_s4 = inlined_call_operand.vmem [shape: f32[64,64], index: 4, kind: input, shape index: {}]   ;;  %s616_s0 = inlined_call_operand.vmem [shape: f32[8,12], index: 0, kind: input, shape index: {}]   ;;  %s617_s5 = inlined_call_operand.vmem [shape: f32[64,2], index: 5, kind: input, shape index: {}]   ;;  %s618_s6 = inlined_call_operand.vmem [shape: f32[3,64], index: 6, kind: input, shape index: {}]   ;;  %s619_s7 = inlined_call_operand.vmem [shape: f32[8,2], index: 7, kind: output, shape index: {}]  }
   0x1   :  { %455 = vmatprep.subr.bf16.mxu1 %v487_v0  ;;  %405 = vmatprep.subr.mxu0 %v488_v1  ;;  %v28_v2 = vld [vmem:[%s612_s2] sm:$0xff]  ;;  %v29_v3 = vld [vmem:[%s612_s2 + $0x8] sm:$0xf]  ;;  %vm457_vm2 = vmpackc.low %vm35_vm0, %vm489_vm1  ;;  %vm31_vm3 = vcmask 31744   ;;  %vm490_vm4 = vmmov 0   ;;  %vm109_vm5 = vcmask 97280  }
   0x2   :  { %v456_v4 = vpack.c.bf16 %v29_v3, %v28_v2  ;;  %v30_v5 = vld [vmem:[%s613_s3] sm:$0xf]  ;;  %407 = vmatprep.mubr.msk.f32.mxu0 %vm490_vm4, %v488_v1  ;;  %414 = vmatprep.mubr.msk.f32.mxu1 %vm490_vm4, %v488_v1  ;;  %v194_v8 = vld [vmem:[%s615_s4 + $0x8] sm:$0xff]  ;;  %v195_v9 = vld [vmem:[%s615_s4 + $0x10] sm:$0xff]  ;;  %vm206_vm6 = vcmask 523264   ;;  %vm367_vm7 = vcmask 15360  }
   0x3   :  { %v27_v6 = vld [vmem:[%s614_s1] sm:$0xff]  ;;  %406 = vmatpush3.msk.msra.mxu0 %vm35_vm0, %v30_v5  ;;  %v196_v12 = vld [vmem:[%s615_s4 + $0x18] sm:$0xff]  ;;  %v198_v15 = vld [vmem:[%s615_s4 + $0x28] sm:$0xff] }
   0x4   :  { %v193_v7 = vld [vmem:[%s615_s4] sm:$0xff]  ;;  %458 = vmatpush3.bf16.msk.msra.mxu1 %vm457_vm2, %v456_v4  ;;  %408 = vmatmul.mubr.msk.f32.vlgmr.msra.gmra.mrb[0].mxu0 %vm31_vm3, %v27_v6  ;;  %v463_v13 = vpack.c.bf16 %v196_v12, %v195_v9  ;;  %v199_v17 = vld [vmem:[%s615_s4 + $0x30] sm:$0xff]  ;;  %v200_v18 = vld [vmem:[%s615_s4 + $0x38] sm:$0xff] }
   0x5   :  { %v26_v10 = vld [vmem:[%s616_s0] sm:$0xff]  ;;  %v460_v11 = vpack.c.bf16 %v194_v8, %v193_v7  ;;  %459 = vmatprep.subr.bf16.mxu0 %v487_v0  ;;  %433 = vmatprep.mubr.msk.f32.mxu0 %vm490_vm4, %v488_v1  ;;  %v469_v19 = vpack.c.bf16 %v200_v18, %v199_v17  ;;  %v283_v21 = vld [vmem:[%s617_s5 + $0x8] sm:$0xff]  ;;  %v284_v22 = vld [vmem:[%s617_s5 + $0x10] sm:$0xff] }
   0x6   :  { %471 = vmatprep.subr.bf16.mxu1 %v487_v0  ;;  %v197_v14 = vld [vmem:[%s615_s4 + $0x20] sm:$0xff]  ;;  %v285_v24 = vld [vmem:[%s617_s5 + $0x18] sm:$0xff]  ;;  %v287_v27 = vld [vmem:[%s617_s5 + $0x28] sm:$0xff] }
   0x7   :  { %461 = vmatpush3.bf16.msra.mxu0 %v460_v11  ;;  %415 = vmatmul.mubr.msk.f32.vlgmr.msra.gmra.mrb[0].mxu1 %vm109_vm5, %v26_v10  ;;  %v466_v16 = vpack.c.bf16 %v198_v15, %v197_v14  ;;  %v282_v20 = vld [vmem:[%s617_s5] sm:$0xff]  ;;  %v475_v25 = vpack.c.bf16 %v285_v24, %v284_v22  ;;  %v288_v37 = vld [vmem:[%s617_s5 + $0x30] sm:$0xff]  ;;  %v289_v38 = vld [vmem:[%s617_s5 + $0x38] sm:$0xff] }
   0x8   :  { %462 = vmatprep.subr.bf16.mxu0 %v487_v0  ;;  %452 = vmatprep.mubr.msk.f32.mxu1 %vm490_vm4, %v488_v1  ;;  %v472_v23 = vpack.c.bf16 %v283_v21, %v282_v20  ;;  %v286_v26 = vld [vmem:[%s617_s5 + $0x20] sm:$0xff]  ;;  %v481_v39 = vpack.c.bf16 %v289_v38, %v288_v37 }
   0x9   :  { %v478_v28 = vpack.c.bf16 %v287_v27, %v286_v26  ;;  %v377_v32 = vld [vmem:[%s618_s6] ss:$0 sm:$0xff]  ;;  %v378_v40 = vld [vmem:[%s618_s6 + $0x1] ss:$0 sm:$0xff]  ;;  %v380_v45 = vld [vmem:[%s618_s6 + $0x2] ss:$0 sm:$0xff] }
   0xa   :  { %473 = vmatpush3.bf16.msra.mxu1 %v472_v23 }
   0xb   :  { %464 = vmatpush3.bf16.msra.mxu0 %v463_v13  ;;  %474 = vmatprep.subr.bf16.mxu1 %v487_v0 }
   0xc   :  { %465 = vmatprep.subr.bf16.mxu0 %v487_v0 }
   0xe   :  { %476 = vmatpush3.bf16.msra.mxu1 %v475_v25 }
   0xf   :  { %467 = vmatpush3.bf16.msra.mxu0 %v466_v16  ;;  %477 = vmatprep.subr.bf16.mxu1 %v487_v0 }
  0x10   :  { %468 = vmatprep.subr.bf16.mxu0 %v487_v0 }
  0x12   :  { %479 = vmatpush3.bf16.msra.mxu1 %v478_v28 }
  0x13   :  { %470 = vmatpush3.bf16.msra.mxu0 %v469_v19  ;;  %480 = vmatprep.subr.bf16.mxu1 %v487_v0 }
  0x16   :  { %482 = vmatpush3.bf16.msra.mxu1 %v481_v39 }
  0xd7   :  { %v105_v29 = vpop.f32.mrb[0].mxu0 }
  0xd8   :  { %v409_v30 = vpop.f32.mrb[1].mxu0 }
  0xda   :  { %v182_v31 = vpop.f32.mrb[0].mxu1 }
  0xdb   :  { %v183_v33 = vadd.f32 %v182_v31, %v105_v29  ;;  %v416_v34 = vpop.f32.mrb[1].mxu1 }
  0xdd   :  { %v191_v35 = vadd.f32 %v377_v32, %v183_v33 }
  0xdf   :  { %v192_v36 = vmax.f32 %v191_v35, 0.0 }
  0xe1   :  { %434 = vmatmul.mubr.msk.f32.vlgmr.msra.gmra.mrb[2].mxu0 %vm206_vm6, %v192_v36 }
 0x1b4   :  { %v276_v41 = vpop.f32.mrb[2].mxu0 }
 0x1b5   :  { %v277_v42 = vadd.f32 %v378_v40, %v276_v41  ;;  %v435_v43 = vpop.f32.mrb[3].mxu0 }
 0x1b7   :  { %v280_v44 = vmax.f32 %v277_v42, 0.0 }
 0x1b9   :  { %453 = vmatmul.mubr.msk.f32.vlgmr.msra.gmra.mrb[2].mxu1 %vm206_vm6, %v280_v44 }
 0x28c   :  { %v363_v46 = vpop.f32.mrb[2].mxu1 }
 0x28d   :  { %v364_v47 = vadd.f32 %v380_v45, %v363_v46  ;;  %v454_v48 = vpop.f32.mrb[3].mxu1 }
 0x28f   :  { %368 = vst.msk [vmem:[%s619_s7] sm:$0xff] %vm367_vm7, %v364_v47 }

</bundles_post_ra>
